<compile_context>
chip_gen: v7x
topology: tpu7x:2x2x1
jax: 0.10.0
libtpu: 0.0.40
codegen_flags: <defaults>
</compile_context>

<pallas_src>
import functools
from typing import Any, NamedTuple, Optional

import jax
import jax.numpy as jnp
from jax import lax
from jax.experimental import pallas as pl
from jax.experimental.pallas import tpu as pltpu


# ----------------------------------------------------------------------------
# Helpers
# ----------------------------------------------------------------------------

def _round_up(x, m):
    return (x + m - 1) // m * m


def _cdiv(a, b):
    return -(-a // b)


def _fit_tile(dim, tile_max, align):
    """Pick a tile (multiple of `align`) minimizing padding of `dim`.

    Returns (tile, padded_dim) with padded_dim = n_tiles * tile."""
    tile_max = max(tile_max, align)
    n_tiles = max(1, _cdiv(dim, tile_max))
    tile = _round_up(_cdiv(dim, n_tiles), align)
    return tile, n_tiles * tile


def _vmem_limit_bytes():
    """Generation-aware VMEM budget: ~48 MiB on v7x (64 MiB physical),
    ~96 MiB on v5e/v6e (128 MiB physical); v7x-safe fallback if the query
    is unavailable."""
    try:
        cap = int(pltpu.get_tpu_info().vmem_capacity_bytes)
        limit = min(cap - (16 << 20), int(cap * 0.75))
    except Exception:
        limit = 48 << 20
    return int(max(limit, 32 << 20))


_NONLINEARITIES = {
    "relu": lambda a: jnp.maximum(a, 0.0),
    "tanh": jnp.tanh,
    "sigmoid": jax.nn.sigmoid,
    "softplus": jax.nn.softplus,
    "elu": jax.nn.elu,
    "gelu": jax.nn.gelu,
    "leaky_relu": lambda a: jnp.where(a >= 0, a, 0.01 * a),
}


# ----------------------------------------------------------------------------
# Kernel
# ----------------------------------------------------------------------------

def _fc_kernel(*refs, nonlinearity, has_bias, multi_k, acc_in_out):
    if has_bias:
        x_ref, w_ref, b_ref, *rest = refs
    else:
        x_ref, w_ref, *rest = refs
        b_ref = None
    o_ref = rest[0]
    acc_ref = rest[1] if (multi_k and not acc_in_out) else None

    # y_tile += x_tile @ w_tile with weight pre-transposed to (In, H):
    # standard ((1,),(0,)) contraction -> no per-tile XLU transpose.
    contrib = lax.dot_general(
        x_ref[...], w_ref[...],
        dimension_numbers=(((1,), (0,)), ((), ())),
        preferred_element_type=jnp.float32)

    def epilogue(acc):
        if has_bias:
            acc = acc + b_ref[...]          # (1, tn) f32, broadcast over rows
        if nonlinearity is not None:
            acc = _NONLINEARITIES[nonlinearity](acc)
        return acc

    if not multi_k:
        # Single K block: no accumulator needed at all.
        o_ref[...] = epilogue(contrib).astype(o_ref.dtype)
        return

    k = pl.program_id(2)
    # Accumulate directly in the resident output tile when it is f32;
    # otherwise use the f32 VMEM scratch.
    tgt = o_ref if acc_in_out else acc_ref

    @pl.when(k == 0)
    def _():
        tgt[...] = contrib

    @pl.when(k > 0)
    def _():
        tgt[...] += contrib

    needs_epilogue = has_bias or (nonlinearity is not None) or (not acc_in_out)
    if needs_epilogue:
        @pl.when(k == pl.num_programs(2) - 1)
        def _():
            o_ref[...] = epilogue(tgt[...]).astype(o_ref.dtype)


# ----------------------------------------------------------------------------
# One-time weight preparation (hoisted out of the per-call path)
# ----------------------------------------------------------------------------

class FCParams(NamedTuple):
    weight_t: jax.Array            # (Inp, Hp), compute dtype, padded, transposed
    bias2d: Optional[jax.Array]    # (1, Hp) f32, or None
    input_size: int
    hidden_size: int
    in_padded: int
    hidden_padded: int
    tn: int
    tk: int
    compute_dtype: Any


def prepare_fc_params(weight, bias=None, *, compute_dtype=jnp.bfloat16,
                      tn_max=512, tk_max=1024, tm_hint=512, collapse_k=True):
    """Prepare FC weights once: cast to the compute dtype (bf16 by default,
    MXU-native on v5e/v6e/v7x), transpose to (In, H), zero-pad to tile-aligned
    shapes, and pre-shape the bias as a (1, Hp) f32 row. Weights are static
    across calls, so none of this is paid per forward pass."""
    weight = jnp.asarray(weight)
    H, In = weight.shape
    tn, Hp = _fit_tile(H, tn_max, 128)

    cs = jnp.dtype(compute_dtype).itemsize
    inp_full = _round_up(In, 128)
    # Collapse the K grid axis entirely when the whole (double-buffered)
    # contraction fits a conservative slice of VMEM: removes per-k
    # accumulator read-modify-write traffic and pipeline flushes.
    resident = (2 * (tm_hint * inp_full + inp_full * tn) * cs
                + 2 * tm_hint * tn * 4)
    if collapse_k and resident <= _vmem_limit_bytes() // 2:
        tk, Inp = inp_full, inp_full
    else:
        tk, Inp = _fit_tile(In, tk_max, 128)

    w_t = weight.astype(compute_dtype).T            # (In, H)
    if (Inp, Hp) != (In, H):
        w_t = jnp.pad(w_t, ((0, Inp - In), (0, Hp - H)))

    b2d = None
    if bias is not None:
        b2d = jnp.asarray(bias).astype(jnp.float32).reshape(1, H)
        if Hp != H:
            b2d = jnp.pad(b2d, ((0, 0), (0, Hp - H)))

    return FCParams(w_t, b2d, In, H, Inp, Hp, tn, tk, compute_dtype)


# ----------------------------------------------------------------------------
# Forward pass
# ----------------------------------------------------------------------------

def fc_layer(x, params: FCParams, nonlinearity=None, *, tm_max=512):
    """x: (B, input_size) -> (B, hidden_size); matches FCLayer.forward."""
    B, In = x.shape
    assert In == params.input_size, "x last dim must equal input_size"
    H, Hp, Inp = params.hidden_size, params.hidden_padded, params.in_padded
    tn, tk = params.tn, params.tk
    cdt = params.compute_dtype
    out_dtype = x.dtype                     # keep caller's dtype for the output

    if jnp.dtype(x.dtype) != jnp.dtype(cdt):
        x = x.astype(cdt)
    # TODO(synk): plumb lax.Precision.HIGHEST for bit-accurate f32 compute if
    #             a caller ever needs it; default precision is used here.

    # Adaptive row tiling: minimal padding, multiple of 8 (sublane rule).
    tm, Bp = _fit_tile(B, tm_max, 8)
    if (Bp, Inp) != (B, In):
        x = jnp.pad(x, ((0, Bp - B), (0, Inp - In)))

    # v7x megacore: make sure there are >= 2 "parallel" blocks to shard.
    if (Bp // tm) * (Hp // tn) < 2 and Hp >= 256:
        cand = (tn // 2) // 128 * 128
        while cand >= 128 and Hp % cand != 0:
            cand -= 128
        if cand >= 128:
            tn = cand

    kg = Inp // tk
    multi_k = kg > 1
    has_bias = params.bias2d is not None
    acc_in_out = multi_k and jnp.dtype(out_dtype) == jnp.dtype(jnp.float32)
    use_scratch = multi_k and not acc_in_out

    if multi_k:
        grid = (Bp // tm, Hp // tn, kg)
        dims = ("parallel", "parallel", "arbitrary")
        x_spec = pl.BlockSpec((tm, tk), lambda i, j, k: (i, k))
        w_spec = pl.BlockSpec((tk, tn), lambda i, j, k: (k, j))
        b_spec = pl.BlockSpec((1, tn), lambda i, j, k: (0, j))
        o_spec = pl.BlockSpec((tm, tn), lambda i, j, k: (i, j))
    else:
        grid = (Bp // tm, Hp // tn)
        dims = ("parallel", "parallel")
        x_spec = pl.BlockSpec((tm, tk), lambda i, j: (i, 0))
        w_spec = pl.BlockSpec((tk, tn), lambda i, j: (0, j))
        b_spec = pl.BlockSpec((1, tn), lambda i, j: (0, j))
        o_spec = pl.BlockSpec((tm, tn), lambda i, j: (i, j))

    inputs = [x, params.weight_t]
    in_specs = [x_spec, w_spec]
    if has_bias:
        inputs.append(params.bias2d)
        in_specs.append(b_spec)

    scratch = [pltpu.VMEM((tm, tn), jnp.float32)] if use_scratch else []

    cs = jnp.dtype(cdt).itemsize
    os_ = jnp.dtype(out_dtype).itemsize
    bytes_accessed = (Bp * Inp * cs + Inp * Hp * cs + Bp * Hp * os_
                      + (Hp * 4 if has_bias else 0))
    transcendentals = (Bp * Hp
                       if nonlinearity in ("tanh", "sigmoid", "gelu",
                                           "softplus", "elu") else 0)

    kernel = functools.partial(
        _fc_kernel, nonlinearity=nonlinearity, has_bias=has_bias,
        multi_k=multi_k, acc_in_out=acc_in_out)

    out = pl.pallas_call(
        kernel,
        out_shape=jax.ShapeDtypeStruct((Bp, Hp), out_dtype),
        grid_spec=pltpu.PrefetchScalarGridSpec(
            num_scalar_prefetch=0,
            grid=grid,
            in_specs=in_specs,
            out_specs=o_spec,
            scratch_shapes=scratch,
        ),
        compiler_params=pltpu.CompilerParams(
            dimension_semantics=dims,
            vmem_limit_bytes=_vmem_limit_bytes(),
        ),
        cost_estimate=pl.CostEstimate(
            flops=2 * Bp * Inp * Hp,
            bytes_accessed=bytes_accessed,
            transcendentals=transcendentals,
        ),
    )(*inputs)

    if (Bp, Hp) != (B, H):
        out = out[:B, :H]
    return out


def fc_layer_once(x, weight, bias=None, nonlinearity=None,
                  compute_dtype=jnp.bfloat16):
    """One-off convenience wrapper (re-does weight prep each call; prefer
    prepare_fc_params + fc_layer when weights are reused)."""
    params = prepare_fc_params(weight, bias, compute_dtype=compute_dtype)
    return fc_layer(x, params, nonlinearity=nonlinearity)


def init_fc_params(key, input_size, hidden_size, bias=True):
    """Deterministic init matching FCLayer.init_hidden():
       weight ~ U(-1/sqrt(in*hid), +1/sqrt(in*hid)), bias = 0."""
    initrange = 1.0 / jnp.sqrt(jnp.float32(input_size * hidden_size))
    w = jax.random.uniform(
        key, (hidden_size, input_size), dtype=jnp.float32,
        minval=-initrange, maxval=initrange)
    b = jnp.zeros((hidden_size,), dtype=jnp.float32) if bias else None
    return w, b


# ----------------------------------------------------------------------------
# Self-test
# ----------------------------------------------------------------------------

if __name__ == "__main__":
    key = jax.random.PRNGKey(0)
    kx, kw, kx2, kw2 = jax.random.split(key, 4)

    # Case 1/2: module-default small shape; bf16 compute, collapsed-K grid.
    batch, input_size, hidden_size = 8, 32, 64
    x = jax.random.normal(kx, (batch, input_size), dtype=jnp.float32)
    weight, bias = init_fc_params(kw, input_size, hidden_size, bias=True)
    params = prepare_fc_params(weight, bias)            # bf16 default

    y = jax.block_until_ready(fc_layer(x, params, nonlinearity=None))
    y_tanh = jax.block_until_ready(fc_layer(x, params, nonlinearity="tanh"))

    ref = x @ weight.T + bias
    assert y.shape == (batch, hidden_size)
    assert jnp.allclose(y, ref, atol=1e-2), "linear mismatch"
    assert jnp.allclose(y_tanh, jnp.tanh(ref), atol=1e-2), "tanh mismatch"

    # Case 3: no bias, relu, explicit f32 compute path (static bias elision).
    w_nb, _ = init_fc_params(kw, input_size, hidden_size, bias=False)
    p_nb = prepare_fc_params(w_nb, None, compute_dtype=jnp.float32)
    y_nb = jax.block_until_ready(fc_layer(x, p_nb, nonlinearity="relu"))
    assert jnp.allclose(y_nb, jnp.maximum(x @ w_nb.T, 0.0), atol=5e-3), \
        "no-bias/f32 mismatch"

    # Case 4: ragged dims + forced multi-step K grid (accumulate-in-output
    # path, zero-padding on every axis, sigmoid epilogue).
    B2, In2, H2 = 20, 380, 300
    x2 = jax.random.normal(kx2, (B2, In2), dtype=jnp.float32)
    w2, b2 = init_fc_params(kw2, In2, H2, bias=True)
    p2 = prepare_fc_params(w2, b2, tn_max=128, tk_max=128, collapse_k=False)
    y2 = jax.block_until_ready(
        fc_layer(x2, p2, nonlinearity="sigmoid", tm_max=8))
    ref2 = jax.nn.sigmoid(x2 @ w2.T + b2)
    assert y2.shape == (B2, H2)
    assert jnp.allclose(y2, ref2, atol=1e-2), "tiled-grid mismatch"

    print("KERNEL_OK")
</pallas_src>

<mosaic_0001>
module attributes {stable_mosaic.version = 11 : i64} {
  func.func @_fc_kernel(%arg0: i32, %arg1: i32, %arg2: memref<8x128xbf16, #tpu.memory_space<vmem>>, %arg3: memref<128x128xbf16, #tpu.memory_space<vmem>>, %arg4: memref<1x128xf32, #tpu.memory_space<vmem>>, %arg5: memref<8x128xf32, #tpu.memory_space<vmem>>) attributes {dimension_semantics = [#tpu.dimension_semantics<parallel>, #tpu.dimension_semantics<parallel>], iteration_bounds = array<i64: 1, 1>, scalar_prefetch = 0 : i64, scratch_operands = 0 : i64, tpu.core_type = #tpu.core_type<tc>, window_params = [{transform_indices = @transform_0, window_bounds = array<i64: 8, 128>}, {transform_indices = @transform_1, window_bounds = array<i64: 128, 128>}, {transform_indices = @transform_2, window_bounds = array<i64: 1, 128>}, {transform_indices = @transform_3, window_bounds = array<i64: 8, 128>}]} {
    %c0 = arith.constant 0 : index
    %c0_0 = arith.constant 0 : index
    %0 = vector.load %arg2[%c0, %c0_0] : memref<8x128xbf16, #tpu.memory_space<vmem>>, vector<8x128xbf16>
    %c0_1 = arith.constant 0 : index
    %c0_2 = arith.constant 0 : index
    %1 = vector.load %arg3[%c0_1, %c0_2] : memref<128x128xbf16, #tpu.memory_space<vmem>>, vector<128x128xbf16>
    %cst = arith.constant dense<0.000000e+00> : vector<8x128xf32>
    %2 = tpu.matmul %0, %1, %cst {dimension_numbers = #tpu.dot_dimension_numbers<[1], [0], [0], [1], [0, 0, 1, 1], [], []>} : vector<8x128xbf16>, vector<128x128xbf16>, vector<8x128xf32> -> vector<8x128xf32>
    %c0_3 = arith.constant 0 : index
    %c0_4 = arith.constant 0 : index
    %3 = vector.load %arg4[%c0_3, %c0_4] : memref<1x128xf32, #tpu.memory_space<vmem>>, vector<1x128xf32>
    %4 = vector.broadcast %3 : vector<1x128xf32> to vector<8x128xf32>
    %5 = arith.addf %2, %4 : vector<8x128xf32>
    %c0_5 = arith.constant 0 : index
    %c0_6 = arith.constant 0 : index
    %6 = vector.load %arg5[%c0_5, %c0_6] : memref<8x128xf32, #tpu.memory_space<vmem>>, vector<8x128xf32>
    tpu.vector_store %arg5[%c0_5, %c0_6], %5 {strides = array<i32>} : memref<8x128xf32, #tpu.memory_space<vmem>>, vector<8x128xf32>,
    return
  }
  func.func @transform_0(%arg0: i32, %arg1: i32) -> (i32, i32) {
    %c0_i32 = arith.constant 0 : i32
    %c0_i32_0 = arith.constant 0 : i32
    return %arg0, %c0_i32 : i32, i32
  }
  func.func @transform_1(%arg0: i32, %arg1: i32) -> (i32, i32) {
    %c0_i32 = arith.constant 0 : i32
    %c0_i32_0 = arith.constant 0 : i32
    return %c0_i32, %arg1 : i32, i32
  }
  func.func @transform_2(%arg0: i32, %arg1: i32) -> (i32, i32) {
    %c0_i32 = arith.constant 0 : i32
    %c0_i32_0 = arith.constant 0 : i32
    return %c0_i32, %arg1 : i32, i32
  }
  func.func @transform_3(%arg0: i32, %arg1: i32) -> (i32, i32) {
    %c0_i32 = arith.constant 0 : i32
    return %arg0, %arg1 : i32, i32
  }
}

</mosaic_0001>

<bundles_post_ra>
// kernel: tpu_custom_call.1
= control target key start
LH: loop header
LB: loop body
LE: loop exit
PB: predicated region body
PF: predicated region fallthrough
CT: control target
= control target key end

     0   :  { %8 = vsyncpa [#allocation3], 0  ;;  %s369_s0 = inlined_call_operand.hbm [shape: bf16[8,128], index: 0, kind: input, shape index: {}]   ;;  %s370_s1 = inlined_call_operand.hbm [shape: bf16[128,128], index: 1, kind: input, shape index: {}]   ;;  %s371_s2 = inlined_call_operand.vmem [shape: f32[1,128], index: 2, kind: input, shape index: {}]   ;;  %s372_s3 = inlined_call_operand.hbm [shape: f32[8,128], index: 3, kind: output, shape index: {}]  }
   0x1   :  { %9 = vsyncpa [#allocation6], 0 }
   0x2   :  { %10 = vsyncpa [#allocation4], 0  ;;  %s296_s12 = smov [#allocation2]   ;;  %s297_s14 = smov [#allocation5]  }
   0x3   :  { %s17_s13 = sshll.u32 %s296_s12, 4  ;;  %s26_s15 = sshll.u32 %s297_s14, 4  ;;  %s18_s13 = int_to_ptr.vmem [resolvable:$true] %s17_s13  ;;  %s323_s15 = int_to_ptr.vmem [resolvable:$true] %s26_s15 }
   0x4   :  { %s224_s18 = scalar_lea.hbm %s369_s0, 64 }
   0x5   :  { %p225_p0 = scmp.ne.s32.totalorder %s369_s0, %s224_s18  ;;  %p228_p1 = scmp.lt.u32.totalorder %s224_s18, %s369_s0 }
   0x7   :  { %p230_p2 = pnand %p228_p1, %p225_p0 }
   0x9   :  { %233 = shalt.err (!%p230_p2)
}
   0xa   :  { %s234_s23 = scalar_lea.vmem %s18_s13, 64  ;;  %p239_p4 = scmp.lt.s32.totalorder %s18_s13, %s18_s13 }
   0xb   :  { %p235_p3 = scmp.ne.s32.totalorder %s18_s13, %s234_s23  ;;  %p240_p5 = scmp.lt.s32.totalorder %s234_s23, %s234_s23 }
   0xd   :  { %p241_p6 = por %p240_p5, %p239_p4 }
   0xf   :  { %p242_p7 = pnand %p241_p6, %p235_p3 }
  0x11   :  { %245 = shalt.err (!%p242_p7)
}
  0x12   :  { %20 = dma.hbm_to_vmem [thread:$0]  %s369_s0, 64, %s18_s13, [#allocation3]  }
  0x13   :  { %s246_s28 = scalar_lea.hbm %s370_s1, 1024 }
  0x14   :  { %p247_p8 = scmp.ne.s32.totalorder %s370_s1, %s246_s28  ;;  %p250_p9 = scmp.lt.u32.totalorder %s246_s28, %s370_s1 }
  0x16   :  { %p252_p10 = pnand %p250_p9, %p247_p8 }
  0x18   :  { %255 = shalt.err (!%p252_p10)
}
  0x19   :  { %s256_s6 = scalar_lea.vmem %s323_s15, 1024  ;;  %p261_p12 = scmp.lt.s32.totalorder %s323_s15, %s323_s15 }
  0x1a   :  { %p257_p11 = scmp.ne.s32.totalorder %s323_s15, %s256_s6  ;;  %p262_p13 = scmp.lt.s32.totalorder %s256_s6, %s256_s6 }
  0x1c   :  { %p263_p0 = por %p262_p13, %p261_p12 }
  0x1e   :  { %p264_p1 = pnand %p263_p0, %p257_p11 }
  0x20   :  { %267 = shalt.err (!%p264_p1)
}
  0x21   :  { %s298_s0 = smov 64   ;;  %s299_s7 = smov 4  }
  0x22   :  { %32 = dma.hbm_to_vmem [thread:$0]  %s370_s1, 1024, %s323_s15, [#allocation6], %s298_s0, %s298_s0, %s299_s7  }
  0x23   :  { %290 = dma.done.wait [#allocation3], 64  }
  0x24   :  { %291 = vsyncadd [#allocation3], 4294967232 }
  0x25   :  { %292 = dma.done.wait [#allocation6], 1024  }
  0x26   :  { %293 = vsyncadd [#allocation6], 4294966272  ;;  %v300_v0 = vmov 0.0   ;;  %vm301_vm0 = vmmov 0   ;;  %v216_v1 = vld [vmem:[#allocation5] sm:$0xff]   ;;  %v217_v2 = vld [vmem:[#allocation5 + $0x8] sm:$0xff]  }
  0x27   :  { %189 = vmatprep.subr.bf16.mxu0 %v300_v0  ;;  %205 = vmatprep.mubr.msk.bf16.mxu0 %vm301_vm0, %v300_v0  ;;  %v218_v3 = vld [vmem:[#allocation5 + $0x10] sm:$0xff]   ;;  %v219_v4 = vld [vmem:[#allocation5 + $0x18] sm:$0xff]   ;;  %v220_v5 = vld [vmem:[#allocation5 + $0x20] sm:$0xff]   ;;  %s302_s11 = smov [#allocation7]  }
  0x28   :  { %190 = vmatpush3.bf16.msra.mxu0 %v216_v1  ;;  %v221_v6 = vld [vmem:[#allocation5 + $0x28] sm:$0xff]   ;;  %v222_v7 = vld [vmem:[#allocation5 + $0x30] sm:$0xff]   ;;  %v223_v8 = vld [vmem:[#allocation5 + $0x38] sm:$0xff]   ;;  %s161_s12 = sshll.u32 %s302_s11, 4  ;;  %s162_s12 = int_to_ptr.vmem [resolvable:$true] %s161_s12 }
  0x29   :  { %191 = vmatprep.subr.bf16.mxu0 %v300_v0  ;;  %v42_v9 = vld [vmem:[#allocation2] sm:$0xf]  ;;  %s268_s13 = scalar_lea.vmem %s162_s12, 128  ;;  %p273_p3 = scmp.lt.s32.totalorder %s162_s12, %s162_s12 }
  0x2a   :  { %v171_v10 = vld [vmem:[%s371_s2] ss:$0 sm:$0xff]  ;;  %p269_p2 = scmp.ne.s32.totalorder %s162_s12, %s268_s13  ;;  %p274_p4 = scmp.lt.s32.totalorder %s268_s13, %s268_s13 }
  0x2c   :  { %192 = vmatpush3.bf16.msra.mxu0 %v217_v2  ;;  %p275_p5 = por %p274_p4, %p273_p3 }
  0x2d   :  { %193 = vmatprep.subr.bf16.mxu0 %v300_v0 }
  0x2e   :  { %p276_p6 = pnand %p275_p5, %p269_p2 }
  0x30   :  { %194 = vmatpush3.bf16.msra.mxu0 %v218_v3 }
  0x31   :  { %195 = vmatprep.subr.bf16.mxu0 %v300_v0 }
  0x34   :  { %196 = vmatpush3.bf16.msra.mxu0 %v219_v4 }
  0x35   :  { %197 = vmatprep.subr.bf16.mxu0 %v300_v0 }
  0x38   :  { %198 = vmatpush3.bf16.msra.mxu0 %v220_v5 }
  0x39   :  { %199 = vmatprep.subr.bf16.mxu0 %v300_v0 }
  0x3c   :  { %200 = vmatpush3.bf16.msra.mxu0 %v221_v6 }
  0x3d   :  { %201 = vmatprep.subr.bf16.mxu0 %v300_v0 }
  0x40   :  { %202 = vmatpush3.bf16.msra.mxu0 %v222_v7 }
  0x41   :  { %203 = vmatprep.subr.bf16.mxu0 %v300_v0 }
  0x44   :  { %204 = vmatpush3.bf16.msra.mxu0 %v223_v8 }
  0x47   :  { %206 = vmatmul.mubr.bf16.vlgmr.msra.gmra.mrb[0].mxu0 %v42_v9 }
 0x11a   :  { %v148_v11 = vpop.f32.mrb[0].mxu0 }
 0x11b   :  { %v149_v12 = vadd.f32 %v171_v10, %v148_v11  ;;  %v207_v13 = vpop.f32.mrb[1].mxu0 }
 0x11c   :  { %v151_v14 = vpop.f32.mrb[2].mxu0 }
 0x11d   :  { %154 = vst [vmem:[#allocation7] sm:$0xff] %v149_v12  ;;  %v208_v15 = vpop.f32.mrb[3].mxu0 }
 0x11e   :  { %279 = shalt.err (!%p276_p6)
}
 0x11f   :  { %s280_s2 = scalar_lea.hbm %s372_s3, 128 }
 0x120   :  { %p281_p7 = scmp.ne.s32.totalorder %s372_s3, %s280_s2  ;;  %p284_p8 = scmp.lt.u32.totalorder %s280_s2, %s372_s3 }
 0x122   :  { %p286_p9 = pnand %p284_p8, %p281_p7 }
 0x124   :  { %289 = shalt.err (!%p286_p9)
}
 0x125   :  { %164 = dma.vmem_to_hbm [thread:$0]  %s162_s12, 128, %s372_s3, [#allocation4]  }
 0x126   :  { %294 = dma.done.wait [#allocation4], 128  }
 0x127   :  { %295 = vsyncadd [#allocation4], 4294967168 }
 0x128   :  { %168 = vsyncpa [#allocation3], 1 }
 0x129   :  { %169 = vsyncpa [#allocation6], 1 }
 0x12a   :  { %170 = vsyncpa [#allocation4], 1 }

</bundles_post_ra>
